<compile_context>
chip_gen: v7x
topology: tpu7x:2x2x1
jax: 0.10.0
libtpu: 0.0.40
codegen_flags: <defaults>
</compile_context>

<pallas_src>
import functools

import jax
import jax.numpy as jnp
from jax import lax
from jax.experimental import pallas as pl
from jax.experimental.pallas import tpu as pltpu


# ----------------------------------------------------------------------------
# Helpers
# ----------------------------------------------------------------------------
def _vmem_limit(block_bytes):
    """Scoped-VMEM request: double-buffered pipeline blocks + headroom, clamped
    to a range valid on every generation (v7x physical VMEM = 64 MiB)."""
    return int(min(max(2 * block_bytes + (8 << 20), 32 << 20), 56 << 20))


def _reduction_tile(k, cap):
    """Largest multiple-of-128 divisor of k that is <= cap (else the full k)."""
    if k <= cap:
        return k
    for cand in range(cap - cap % 128, 0, -128):
        if k % cand == 0:
            return cand
    # TODO(synk): pad/mask the K tail instead of one whole-K block for hidden
    # sizes that are not a multiple of 128.
    return k


def _row_tile(t, cap=256):
    """Query-row tile: full extent if small, else a multiple-of-8 divisor."""
    if t <= cap:
        return t
    for cand in (256, 128, 64, 32, 16, 8):
        if cand <= cap and t % cand == 0:
            return cand
    return t


# ----------------------------------------------------------------------------
# Tiled linear kernel:  y = x @ W_t + b   (W_t pre-transposed)
# Shared by the generic 2-D path and the fused-QKV path (3-D w/b/out blocks).
# ----------------------------------------------------------------------------
def _linear_kernel(x_ref, w_ref, b_ref, o_ref, acc_ref):
    k = pl.program_id(2)

    @pl.when(k == 0)
    def _():
        acc_ref[...] = jnp.zeros_like(acc_ref)

    w = w_ref[0] if len(w_ref.shape) == 3 else w_ref[...]
    # Native-dtype operands (full-rate MXU); f32 accumulation via
    # preferred_element_type -- no explicit upcast copies.
    acc_ref[...] += jnp.dot(x_ref[...], w, preferred_element_type=jnp.float32)

    @pl.when(k == pl.num_programs(2) - 1)
    def _():
        b = b_ref[0] if len(b_ref.shape) == 3 else b_ref[...]
        out = (acc_ref[...] + b.astype(jnp.float32)).astype(o_ref.dtype)
        if len(o_ref.shape) == 3:
            o_ref[0] = out
        else:
            o_ref[...] = out


def linear(x2d, w_t, b, *, tm=512, tn=512, tk_cap=512):
    """x2d: [M, K], w_t: [K, N] (= W^T), b: [N]  ->  [M, N]."""
    m, k = x2d.shape
    n = w_t.shape[-1]
    tm = m if m <= tm else tm            # multiple of 8 or full extent
    tn = n if n <= tn else tn            # multiple of 128 or full extent
    tk = _reduction_tile(k, tk_cap)      # divides K exactly
    grid = (pl.cdiv(m, tm), pl.cdiv(n, tn), k // tk)
    itm = x2d.dtype.itemsize
    blocks = (tm * tk + tk * tn + tn + tm * tn) * itm + tm * tn * 4
    return pl.pallas_call(
        _linear_kernel,
        grid=grid,
        in_specs=[
            pl.BlockSpec((tm, tk), lambda i, j, kk: (i, kk)),
            pl.BlockSpec((tk, tn), lambda i, j, kk: (kk, j)),
            pl.BlockSpec((1, tn), lambda i, j, kk: (0, j)),
        ],
        out_specs=pl.BlockSpec((tm, tn), lambda i, j, kk: (i, j)),
        out_shape=jax.ShapeDtypeStruct((m, n), x2d.dtype),
        scratch_shapes=[pltpu.VMEM((tm, tn), jnp.float32)],
        compiler_params=pltpu.CompilerParams(
            dimension_semantics=("parallel", "parallel", "arbitrary"),
            vmem_limit_bytes=_vmem_limit(blocks)),
    )(x2d, w_t, b.reshape(1, n))


def linear_qkv(x2d, w3_t, b3, *, tm=512, tk_cap=512):
    """Fused self-attention projection.
    x2d: [M, K], w3_t: [3, K, E], b3: [3, 1, E]  ->  [3, M, E].
    The j grid axis selects Q/K/V; the kernel writes directly into the
    [3, M, E] slab so no host-side slicing of a [M, 3E] result is needed."""
    m, k = x2d.shape
    e = w3_t.shape[-1]
    tm = m if m <= tm else tm
    tk = _reduction_tile(k, tk_cap)
    grid = (pl.cdiv(m, tm), 3, k // tk)
    itm = x2d.dtype.itemsize
    blocks = (tm * tk + tk * e + e + tm * e) * itm + tm * e * 4
    return pl.pallas_call(
        _linear_kernel,
        grid=grid,
        in_specs=[
            pl.BlockSpec((tm, tk), lambda i, j, kk: (i, kk)),
            pl.BlockSpec((1, tk, e), lambda i, j, kk: (j, kk, 0)),
            pl.BlockSpec((1, 1, e), lambda i, j, kk: (j, 0, 0)),
        ],
        out_specs=pl.BlockSpec((1, tm, e), lambda i, j, kk: (j, i, 0)),
        out_shape=jax.ShapeDtypeStruct((3, m, e), x2d.dtype),
        scratch_shapes=[pltpu.VMEM((tm, e), jnp.float32)],
        compiler_params=pltpu.CompilerParams(
            dimension_semantics=("parallel", "parallel", "arbitrary"),
            vmem_limit_bytes=_vmem_limit(blocks)),
    )(x2d, w3_t, b3)


# ----------------------------------------------------------------------------
# Attention kernel: one (batch, q-row-tile) per grid step, all heads inside.
#   q block [1, tq, E] (heads packed along lanes), k/v blocks [1, S, E]
#   outputs: o [1, tq, E] (single lane-dense store from an f32 VMEM slab) and,
#   if requested, head-AVERAGED weights [1, tq, S].
# ----------------------------------------------------------------------------
def _attn_kernel(*refs, num_heads, head_dim, need_weights):
    if need_weights:
        q_ref, k_ref, v_ref, o_ref, w_ref, o_acc, w_acc = refs
    else:
        q_ref, k_ref, v_ref, o_ref, o_acc = refs
        w_ref = w_acc = None

    dn = (((1,), (1,)), ((), ()))      # contract last dims -> no K transpose
    for h in range(num_heads):         # static unrolled loop over heads
        lo = h * head_dim
        qh = q_ref[0, :, lo:lo + head_dim]   # [tq, hd] native dtype (ref slice)
        kh = k_ref[0, :, lo:lo + head_dim]   # [S,  hd]
        vh = v_ref[0, :, lo:lo + head_dim]   # [S,  hd]

        sc = lax.dot_general(qh, kh, dn, preferred_element_type=jnp.float32)  # [tq, S]
        sc = sc - jnp.max(sc, axis=-1, keepdims=True)
        p = jnp.exp(sc)
        den = jnp.sum(p, axis=-1, keepdims=True)
        inv = pl.reciprocal(den, approx=True)     # EUP slot, off the VALU path
        inv = inv * (2.0 - den * inv)             # one Newton step -> ~f32 exact
        p = p * inv
        # TODO(synk): attn_mask / key_padding_mask additive masking and dropout
        # (module default p=0.0 -> identity) are not implemented.

        # Per-head PV result goes straight into the f32 VMEM slab.
        o_acc[:, lo:lo + head_dim] = jnp.dot(
            p.astype(v_ref.dtype), vh, preferred_element_type=jnp.float32)

        if need_weights:
            if h == 0:
                w_acc[...] = p
            else:
                w_acc[...] += p

    o_ref[0] = o_acc[...].astype(o_ref.dtype)                        # one dense store
    if need_weights:
        w_ref[0] = (w_acc[...] * (1.0 / num_heads)).astype(w_ref.dtype)


def attention(qb, kb, vb, num_heads, head_dim, *, need_weights=True):
    """qb: [B, T, E], kb/vb: [B, S, E] -> ([B, T, E], head-averaged [B, T, S] | None)."""
    # TODO(synk): flash-style online-softmax KV tiling for long sequences; the
    # full [S, E] K/V block and [tq, S] scores currently live in one grid step.
    B, T, E = qb.shape
    S = kb.shape[1]
    tq = _row_tile(T)
    grid = (B, pl.cdiv(T, tq))
    kernel = functools.partial(_attn_kernel, num_heads=num_heads,
                               head_dim=head_dim, need_weights=need_weights)
    itm = qb.dtype.itemsize
    blocks = (tq * E + 2 * S * E + tq * E) * itm + tq * S * 4 + (tq * E + tq * S) * 4
    cp = pltpu.CompilerParams(
        dimension_semantics=("parallel", "parallel"),
        vmem_limit_bytes=_vmem_limit(blocks))
    in_specs = [
        pl.BlockSpec((1, tq, E), lambda b, ti: (b, ti, 0)),
        pl.BlockSpec((1, S, E), lambda b, ti: (b, 0, 0)),
        pl.BlockSpec((1, S, E), lambda b, ti: (b, 0, 0)),
    ]
    if need_weights:
        o, w = pl.pallas_call(
            kernel,
            grid=grid,
            in_specs=in_specs,
            out_specs=[pl.BlockSpec((1, tq, E), lambda b, ti: (b, ti, 0)),
                       pl.BlockSpec((1, tq, S), lambda b, ti: (b, ti, 0))],
            out_shape=(jax.ShapeDtypeStruct((B, T, E), qb.dtype),
                       jax.ShapeDtypeStruct((B, T, S), jnp.float32)),
            scratch_shapes=[pltpu.VMEM((tq, E), jnp.float32),
                            pltpu.VMEM((tq, S), jnp.float32)],
            compiler_params=cp,
        )(qb, kb, vb)
        return o, w
    o = pl.pallas_call(
        kernel,
        grid=grid,
        in_specs=in_specs,
        out_specs=pl.BlockSpec((1, tq, E), lambda b, ti: (b, ti, 0)),
        out_shape=jax.ShapeDtypeStruct((B, T, E), qb.dtype),
        scratch_shapes=[pltpu.VMEM((tq, E), jnp.float32)],
        compiler_params=cp,
    )(qb, kb, vb)
    return o, None


# ----------------------------------------------------------------------------
# Module wrapper
# ----------------------------------------------------------------------------
class MultiheadAttentionPallas:
    def __init__(self, embed_dim=32, num_heads=4, bias=True, key=None):
        assert embed_dim % num_heads == 0
        self.embed_dim = embed_dim
        self.num_heads = num_heads
        self.head_dim = embed_dim // num_heads
        self.scaling = float(self.head_dim) ** -0.5

        key = jax.random.PRNGKey(0) if key is None else key
        ks = jax.random.split(key, 8)
        limit_w = (6.0 / (embed_dim + embed_dim)) ** 0.5       # xavier_uniform_
        limit_b = 1.0 / (embed_dim ** 0.5)                     # default Linear bias init

        def w_init(k):
            return jax.random.uniform(k, (embed_dim, embed_dim), jnp.float32,
                                      -limit_w, limit_w)

        def b_init(k):
            if not bias:
                return jnp.zeros((embed_dim,), jnp.float32)
            return jax.random.uniform(k, (embed_dim,), jnp.float32,
                                      -limit_b, limit_b)

        self.wq, self.wk, self.wv, self.wo = (w_init(k) for k in ks[:4])
        self.bq, self.bk, self.bv, self.bo = (b_init(k) for k in ks[4:])

        # Kernel-side parameters: 1/sqrt(head_dim) folded into the Q projection,
        # weights pre-transposed to [in, out], fused QKV stacked as [3, E, E]
        # so the fused linear can write a [3, M, E] slab directly.
        wq_s, bq_s = self.wq * self.scaling, self.bq * self.scaling
        self.w_qkv3_t = jnp.stack([wq_s.T, self.wk.T, self.wv.T])        # [3, E, E]
        self.b_qkv3 = jnp.stack([bq_s, self.bk, self.bv])[:, None, :]    # [3, 1, E]
        self.wq_t, self.bq_s = wq_s.T, bq_s
        self.wk_t = self.wk.T
        self.wv_t = self.wv.T
        self.wo_t = self.wo.T

    def __call__(self, query, key, value, need_weights=True):
        T, B, E = query.shape
        S = key.shape[0]

        # One [L,B,E] -> [B,L,E] transpose of the RAW inputs; activations stay
        # [B,L,E] through projections + attention (no post-projection transposes).
        q_bte = jnp.transpose(query, (1, 0, 2))
        if query is key and key is value:
            # Fused QKV projection: one pallas_call writing [3, B*T, E].
            qkv = linear_qkv(q_bte.reshape(B * T, E), self.w_qkv3_t, self.b_qkv3)
            qkv = qkv.reshape(3, B, T, E)
            Qb, Kb, Vb = qkv[0], qkv[1], qkv[2]
        else:
            k_bse = jnp.transpose(key, (1, 0, 2))
            v_bse = jnp.transpose(value, (1, 0, 2))
            Qb = linear(q_bte.reshape(B * T, E), self.wq_t, self.bq_s).reshape(B, T, E)
            Kb = linear(k_bse.reshape(B * S, E), self.wk_t, self.bk).reshape(B, S, E)
            Vb = linear(v_bse.reshape(B * S, E), self.wv_t, self.bv).reshape(B, S, E)

        attn_out, attn_w = attention(Qb, Kb, Vb, self.num_heads, self.head_dim,
                                     need_weights=need_weights)

        # Out projection is row-independent -> feed [B*T, E] directly.
        Z = linear(attn_out.reshape(B * T, E), self.wo_t, self.bo)
        Z = jnp.transpose(Z.reshape(B, T, E), (1, 0, 2))     # [T, B, E]
        return Z, attn_w                                     # attn_w: [B, T, S] | None


# ----------------------------------------------------------------------------
# Pure-JAX reference (same math as the PyTorch module) for correctness check
# ----------------------------------------------------------------------------
def reference_forward(m, query, key, value):
    T, B, E = query.shape
    S = key.shape[0]
    H, hd = m.num_heads, m.head_dim
    Q = query.reshape(T * B, E) @ m.wq.T + m.bq
    K = key.reshape(S * B, E) @ m.wk.T + m.bk
    V = value.reshape(S * B, E) @ m.wv.T + m.bv
    Q = Q.reshape(T, B * H, hd).transpose(1, 0, 2) * (float(hd) ** -0.5)
    K = K.reshape(S, B * H, hd).transpose(1, 0, 2)
    V = V.reshape(S, B * H, hd).transpose(1, 0, 2)
    s = jnp.einsum("btd,bsd->bts", Q, K)
    p = jax.nn.softmax(s, axis=-1)
    o = jnp.einsum("bts,bsd->btd", p, V)
    o = o.transpose(1, 0, 2).reshape(T, B, E)
    Z = (o.reshape(T * B, E) @ m.wo.T + m.bo).reshape(T, B, E)
    return Z, p.reshape(B, H, T, S).sum(axis=1) / H


# ----------------------------------------------------------------------------
if __name__ == "__main__":
    embed_dim, num_heads = 32, 4
    tgt_len, src_len, bsz = 8, 16, 2

    root = jax.random.PRNGKey(0)
    k_param, k_src, kq, kk, kv = jax.random.split(root, 5)

    mha = MultiheadAttentionPallas(embed_dim=embed_dim, num_heads=num_heads, key=k_param)

    # 1) Self-attention (fused QKV path) -- the common BERT encoder case.
    src = jax.random.normal(k_src, (tgt_len, bsz, embed_dim), jnp.float32)
    Z1, W1 = mha(src, src, src)
    jax.block_until_ready((Z1, W1))
    Z1_ref, W1_ref = reference_forward(mha, src, src, src)
    assert jnp.allclose(Z1, Z1_ref, atol=2e-3, rtol=2e-3), "self-attn output mismatch"
    assert jnp.allclose(W1, W1_ref, atol=2e-3, rtol=2e-3), "self-attn weights mismatch"

    # 2) Cross-attention (separate projections, src_len != tgt_len).
    q_in = jax.random.normal(kq, (tgt_len, bsz, embed_dim), jnp.float32)
    k_in = jax.random.normal(kk, (src_len, bsz, embed_dim), jnp.float32)
    v_in = jax.random.normal(kv, (src_len, bsz, embed_dim), jnp.float32)
    Z2, W2 = mha(q_in, k_in, v_in)
    jax.block_until_ready((Z2, W2))
    Z2_ref, W2_ref = reference_forward(mha, q_in, k_in, v_in)
    assert jnp.allclose(Z2, Z2_ref, atol=2e-3, rtol=2e-3), "cross-attn output mismatch"
    assert jnp.allclose(W2, W2_ref, atol=2e-3, rtol=2e-3), "cross-attn weights mismatch"

    # 3) need_weights=False path (skips the [B,T,S] HBM writeback entirely).
    Z3, W3 = mha(src, src, src, need_weights=False)
    jax.block_until_ready(Z3)
    assert W3 is None
    assert jnp.allclose(Z3, Z1_ref, atol=2e-3, rtol=2e-3), "no-weights output mismatch"

    print("KERNEL_OK")
</pallas_src>

<mosaic_0001>
module attributes {stable_mosaic.version = 11 : i64} {
  func.func @_linear_kernel(%arg0: i32, %arg1: i32, %arg2: i32, %arg3: memref<16x32xf32, #tpu.memory_space<vmem>>, %arg4: memref<1x32x32xf32, #tpu.memory_space<vmem>>, %arg5: memref<1x1x32xf32, #tpu.memory_space<vmem>>, %arg6: memref<1x16x32xf32, #tpu.memory_space<vmem>>, %arg7: memref<16x32xf32, #tpu.memory_space<vmem>>) attributes {dimension_semantics = [#tpu.dimension_semantics<parallel>, #tpu.dimension_semantics<parallel>, #tpu.dimension_semantics<arbitrary>], iteration_bounds = array<i64: 1, 3, 1>, scalar_prefetch = 0 : i64, scratch_operands = 1 : i64, tpu.core_type = #tpu.core_type<tc>, window_params = [{transform_indices = @transform_0, window_bounds = array<i64: 16, 32>}, {transform_indices = @transform_1, window_bounds = array<i64: 1, 32, 32>}, {transform_indices = @transform_2, window_bounds = array<i64: 1, 1, 32>}, {transform_indices = @transform_3, window_bounds = array<i64: 1, 16, 32>}]} {
    %c0_i32 = arith.constant 0 : i32
    %0 = arith.cmpi eq, %arg2, %c0_i32 : i32
    %1 = arith.extui %0 : i1 to i32
    %c0_i32_0 = arith.constant 0 : i32
    %2 = arith.cmpi ne, %1, %c0_i32_0 : i32
    scf.if %2 {
      %cst_11 = arith.constant 0.000000e+00 : f32
      %13 = vector.broadcast %cst_11 : f32 to vector<16x32xf32>
      %c0_12 = arith.constant 0 : index
      %c0_13 = arith.constant 0 : index
      %14 = vector.load %arg7[%c0_12, %c0_13] : memref<16x32xf32, #tpu.memory_space<vmem>>, vector<16x32xf32>
      tpu.vector_store %arg7[%c0_12, %c0_13], %13 {strides = array<i32>} : memref<16x32xf32, #tpu.memory_space<vmem>>, vector<16x32xf32>,
    } else {
    }
    %c0 = arith.constant 0 : index
    %c0_1 = arith.constant 0 : index
    %c0_2 = arith.constant 0 : index
    %3 = vector.load %arg4[%c0, %c0_1, %c0_2] : memref<1x32x32xf32, #tpu.memory_space<vmem>>, vector<1x32x32xf32>
    %4 = vector.shape_cast %3 : vector<1x32x32xf32> to vector<32x32xf32>
    %c0_3 = arith.constant 0 : index
    %c0_4 = arith.constant 0 : index
    %5 = vector.load %arg7[%c0_3, %c0_4] : memref<16x32xf32, #tpu.memory_space<vmem>>, vector<16x32xf32>
    %c0_5 = arith.constant 0 : index
    %c0_6 = arith.constant 0 : index
    %6 = vector.load %arg3[%c0_5, %c0_6] : memref<16x32xf32, #tpu.memory_space<vmem>>, vector<16x32xf32>
    %cst = arith.constant dense<0.000000e+00> : vector<16x32xf32>
    %7 = tpu.matmul %6, %4, %cst {dimension_numbers = #tpu.dot_dimension_numbers<[1], [0], [0], [1], [0, 0, 1, 1], [], []>} : vector<16x32xf32>, vector<32x32xf32>, vector<16x32xf32> -> vector<16x32xf32>
    %8 = arith.addf %5, %7 : vector<16x32xf32>
    %c0_7 = arith.constant 0 : index
    %c0_8 = arith.constant 0 : index
    %9 = vector.load %arg7[%c0_7, %c0_8] : memref<16x32xf32, #tpu.memory_space<vmem>>, vector<16x32xf32>
    tpu.vector_store %arg7[%c0_7, %c0_8], %8 {strides = array<i32>} : memref<16x32xf32, #tpu.memory_space<vmem>>, vector<16x32xf32>,
    %c0_i32_9 = arith.constant 0 : i32
    %10 = arith.cmpi eq, %arg2, %c0_i32_9 : i32
    %11 = arith.extui %10 : i1 to i32
    %c0_i32_10 = arith.constant 0 : i32
    %12 = arith.cmpi ne, %11, %c0_i32_10 : i32
    scf.if %12 {
      %c0_11 = arith.constant 0 : index
      %c0_12 = arith.constant 0 : index
      %c0_13 = arith.constant 0 : index
      %13 = vector.load %arg5[%c0_11, %c0_12, %c0_13] : memref<1x1x32xf32, #tpu.memory_space<vmem>>, vector<1x1x32xf32>
      %14 = vector.shape_cast %13 : vector<1x1x32xf32> to vector<1x32xf32>
      %c0_14 = arith.constant 0 : index
      %c0_15 = arith.constant 0 : index
      %15 = vector.load %arg7[%c0_14, %c0_15] : memref<16x32xf32, #tpu.memory_space<vmem>>, vector<16x32xf32>
      %16 = vector.broadcast %14 : vector<1x32xf32> to vector<16x32xf32>
      %17 = arith.addf %15, %16 : vector<16x32xf32>
      %c0_16 = arith.constant 0 : index
      %c0_17 = arith.constant 0 : index
      %c0_18 = arith.constant 0 : index
      %18 = vector.load %arg6[%c0_16, %c0_17, %c0_18] : memref<1x16x32xf32, #tpu.memory_space<vmem>>, vector<1x16x32xf32>
      %19 = vector.shape_cast %18 : vector<1x16x32xf32> to vector<16x32xf32>
      %20 = vector.shape_cast %17 : vector<16x32xf32> to vector<1x16x32xf32>
      tpu.vector_store %arg6[%c0_16, %c0_17, %c0_18], %20 {strides = array<i32>} : memref<1x16x32xf32, #tpu.memory_space<vmem>>, vector<1x16x32xf32>,
    } else {
    }
    return
  }
  func.func @transform_0(%arg0: i32, %arg1: i32, %arg2: i32) -> (i32, i32) {
    %c0_i32 = arith.constant 0 : i32
    return %arg0, %arg2 : i32, i32
  }
  func.func @transform_1(%arg0: i32, %arg1: i32, %arg2: i32) -> (i32, i32, i32) {
    %c0_i32 = arith.constant 0 : i32
    %c0_i32_0 = arith.constant 0 : i32
    return %arg1, %arg2, %c0_i32 : i32, i32, i32
  }
  func.func @transform_2(%arg0: i32, %arg1: i32, %arg2: i32) -> (i32, i32, i32) {
    %c0_i32 = arith.constant 0 : i32
    %c0_i32_0 = arith.constant 0 : i32
    %c0_i32_1 = arith.constant 0 : i32
    return %arg1, %c0_i32, %c0_i32_0 : i32, i32, i32
  }
  func.func @transform_3(%arg0: i32, %arg1: i32, %arg2: i32) -> (i32, i32, i32) {
    %c0_i32 = arith.constant 0 : i32
    %c0_i32_0 = arith.constant 0 : i32
    return %arg1, %arg0, %c0_i32 : i32, i32, i32
  }
}

</mosaic_0001>

<bundles_post_ra>
// kernel: tpu_custom_call.1
= control target key start
LH: loop header
LB: loop body
LE: loop exit
PB: predicated region body
PF: predicated region fallthrough
CT: control target
= control target key end

     0   :  { %8 = vsyncpa [#allocation4], 0  ;;  %s1041_s0 = inlined_call_operand.hbm [shape: f32[16,32], index: 0, kind: input, shape index: {}]   ;;  %s1042_s1 = inlined_call_operand.hbm [shape: f32[3,32,32], index: 1, kind: input, shape index: {}]   ;;  %s1043_s2 = inlined_call_operand.vmem [shape: f32[3,1,32], index: 2, kind: input, shape index: {}]   ;;  %s1044_s3 = inlined_call_operand.hbm [shape: f32[3,16,32], index: 3, kind: output, shape index: {}]  }
   0x1   :  { %9 = vsyncpa [#allocation7], 0 }
   0x2   :  { %11 = vsyncpa [#allocation7 + $0x1], 0 }
   0x3   :  { %12 = vsyncpa [#allocation5], 0 }
   0x4   :  { %14 = vsyncpa [#allocation5 + $0x1], 0  ;;  %s804_s12 = smov 0   ;;  %s806_s13 = smov 0  }
   0x5   :  { %s808_s14 = smov 0   ;;  %s810_s15 = smov 0  }
   0x6   :  { %s812_s16 = smov 0   ;;  %s814_s17 = smov 0  }
   0x7 LB: > { %s505_s18 = sadd.s32 4294967295, %s774_s17   ;;  %s506_s19 = sadd.s32 4294967294, %s774_s17   ;;  %s774_s17 = sphi %s814_s17, %s20_s17   ;;  %s770_s16 = sphi %s812_s16, %s1067_s16   ;;  %s766_s15 = sphi %s810_s15, %s1066_s15   ;;  %s762_s14 = sphi %s808_s14, %s1065_s14   ;;  %s758_s13 = sphi %s806_s13, %s1064_s13   ;;  %s754_s12 = sphi %s804_s12, %s1063_s12  }
   0x8   : > { %p89_p0 = scmp.ne.s32.totalorder %s758_s13, %s754_s12  ;;  %p838_p1 = scmp.eq.s32.totalorder %s505_s18, 0 }
   0x9   : > { %p842_p2 = scmp.eq.s32.totalorder %s505_s18, 2  ;;  %p147_p3 = scmp.eq.s32.totalorder %s506_s19, 2 }
   0xa   : > { %s1049_s20 = scalar_select %p838_p1, 1, 0 }
   0xb   : > { %s1050_s21 = scalar_select %p842_p2, 1, 0 }
   0xc   : > { %p848_p4 = por %p838_p1, %p89_p0  ;;  %p507_p5 = scmp.ge.s32.totalorder %s774_s17, 1 }
   0xd   : > { %p853_p6 = por %p147_p3, %p89_p0  ;;  %p154_p7 = scmp.lt.s32.totalorder %s774_s17, 4 }
   0xe   : > { %s1051_s22 = scalar_select %p848_p4, 1, 0 }
   0xf   : > { %s1052_s23 = scalar_select %p853_p6, 1, 0 }
  0x10   : > { %p858_p8 = pnand %p507_p5, %p154_p7  ;;  %s776_s25 = smov [#allocation3]  }
  0x11   : > { %s170_s26 = sshll.u32 %s776_s25, 4  ;;  %s35_s28 = sadd.s32 1, %s770_s16  ;;  %s171_s26 = int_to_ptr.vmem [resolvable:$true] %s170_s26 }
  0x12   : > { %s1053_s24 = scalar_select %p858_p8, 1, 0 }
  0x13   : > { %p560_p9 = pneg %p858_p8  ;;  %s630_s4 = scalar_lea.hbm %s1041_s0, 256 }
  0x14   : > { %p631_p11 = scmp.ne.s32.totalorder %s1041_s0, %s630_s4  ;;  %p637_p3 = scmp.lt.u32.totalorder %s630_s4, %s1041_s0 }
  0x15   : > { %p866_p10 = pnand %p560_p9, %p838_p1 }
  0x17   : > { %p632_p12 = pneg %p866_p10 }
  0x19   : > { %p633_p13 = pnand %p632_p12, %p631_p11 }
  0x1b   : > { %p634_p0 = pneg %p633_p13 }
  0x1d   : > { %p639_p5 = pnand %p637_p3, %p634_p0 }
  0x1f   : > { %642 = shalt.err (!%p639_p5)
}
  0x20   : > { %s643_s9 = scalar_lea.vmem %s171_s26, 256  ;;  %p651_p4 = scmp.lt.s32.totalorder %s171_s26, %s171_s26 }
  0x21   : > { %p644_p7 = scmp.ne.s32.totalorder %s171_s26, %s643_s9  ;;  %p652_p1 = scmp.lt.s32.totalorder %s643_s9, %s643_s9 }
  0x23   : > { %p646_p9 = pnand %p644_p7, %p632_p12  ;;  %p653_p8 = por %p652_p1, %p651_p4 }
  0x25   : > { %p647_p6 = pneg %p646_p9 }
  0x27   : > { %p654_p2 = pnand %p653_p8, %p647_p6 }
  0x29   : > { %657 = shalt.err (!%p654_p2)
}
  0x2a   : > { %s777_s10 = smov 128   ;;  %s778_s11 = smov 8  }
  0x2b   : > { %563 = dma.hbm_to_vmem [thread:$0]  (!%p866_p10), %s1041_s0, 256, %s171_s26, [#allocation4], %s777_s10, %s777_s10, %s778_s11  }
  0x2c   : > { %p37_p1 = scmp.ge.s32.totalorder %s35_s28, 3  ;;  %s76_s25 = sadd.s32 1, %s762_s14 }
  0x2d   : > { %p83_p2 = scmp.ne.s32.totalorder %s762_s14, %s758_s13  ;;  %p84_p4 = scmp.eq.s32.totalorder %s774_s17, 0 }
  0x2e   : > { %s1069_s28 = smov (%p37_p1, %s35_s28), 0  ;;  %p1056_p8 = scmp.ne.s32.totalorder %s1050_s21, 0 }
  0x2f   : > { %p896_p6 = por %p84_p4, %p83_p2  ;;  %s71_s30 = ssub.s32 %s770_s16, %s1069_s28 }
  0x30   : > { %p902_p11 = por %p1056_p8, %p83_p2  ;;  %p573_p12 = scmp.lt.s32.totalorder %s774_s17, 3 }
  0x31   : > { %p74_p10 = scmp.eq.s32.totalorder %s71_s30, 0  ;;  %s184_s26 = sand.u32 1, %s762_s14  }
  0x32   : > { %s510_s4 = sshll.u32 %s184_s26, 5  ;;  %s525_s6 = sshll.u32 %s770_s16, 9 }
  0x33   : > { %s911_s5 = scalar_select %p74_p10, %s762_s14, %s76_s25  }
  0x34   : > { %s917_s9 = scalar_lea.hbm %s1042_s1, %s525_s6  ;;  %s188_s21 = scalar_lea.vmem [#allocation6], %s510_s4 }
  0x35   : > { %s197_s18 = sshll.u32 %s188_s21, 4  ;;  %p923_p13 = pnand %p573_p12, %p896_p6  ;;  %s919_s18 = int_to_ptr.vmem [resolvable:$true] %s197_s18 }
  0x36   : > { %s927_s25 = scalar_lea.sflag [#allocation7], %s184_s26  ;;  %s658_s30 = scalar_lea.hbm %s917_s9, 512 }
  0x37   : > { %p659_p0 = scmp.ne.s32.totalorder %s917_s9, %s658_s30  ;;  %p660_p3 = pneg %p923_p13 }
  0x38   : > { %s663_s29 = scalar_lea.hbm %s1042_s1, 1536  ;;  %p664_p9 = scmp.lt.u32.totalorder %s917_s9, %s1042_s1 }
  0x39   : > { %p661_p5 = pnand %p660_p3, %p659_p0  ;;  %p665_p1 = scmp.lt.u32.totalorder %s663_s29, %s658_s30 }
  0x3a   : > { %p667_p4 = scmp.lt.u32.totalorder %s658_s30, %s917_s9 }
  0x3b   : > { %p662_p7 = pneg %p661_p5  ;;  %p666_p2 = por %p665_p1, %p664_p9 }
  0x3d   : > { %p668_p6 = por %p667_p4, %p666_p2 }
  0x3f   : > { %p669_p8 = pnand %p668_p6, %p662_p7 }
  0x41   : > { %672 = shalt.err (!%p669_p8)
}
  0x42   : > { %s673_s26 = scalar_lea.vmem %s919_s18, 512  ;;  %s779_s21 = smov [#allocation6]  }
  0x43   : > { %p674_p12 = scmp.ne.s32.totalorder %s919_s18, %s673_s26  ;;  %s678_s4 = sshll.u32 %s779_s21, 4  ;;  %s679_s4 = int_to_ptr.vmem [resolvable:$false] %s678_s4 }
  0x44   : > { %s680_s6 = scalar_lea.vmem %s679_s4, 1024  ;;  %p681_p5 = scmp.lt.s32.totalorder %s919_s18, %s679_s4 }
  0x45   : > { %p676_p10 = pnand %p674_p12, %p660_p3  ;;  %p682_p9 = scmp.lt.s32.totalorder %s680_s6, %s673_s26 }
  0x47   : > { %p677_p0 = pneg %p676_p10  ;;  %p683_p1 = por %p682_p9, %p681_p5 }
  0x49   : > { %p684_p2 = pnand %p683_p1, %p677_p0 }
  0x4b   : > { %687 = shalt.err (!%p684_p2)
}
  0x4c   : > { %567 = dma.hbm_to_vmem [thread:$0]  (!%p923_p13), %s917_s9, 512, %s919_s18, %s927_s25, %s777_s10, %s777_s10, %s778_s11  }
  0x4d   : > { %p1059_p3 = scmp.ne.s32.totalorder %s1053_s24, 0 }
  0x4e   : > { %p1060_p7 = scmp.ne.s32.totalorder (!%p1059_p3), %s1049_s20, 0 }
  0x4f   : > { %215 = sbr.rel (%p1059_p3) target bundleno = 342 (0x156), region = 32 }
  0x56   : > { %741 = dma.done.wait (%p1060_p7), [#allocation4], 256  }
  0x57   : > { %743 = vsyncadd (%p1060_p7), [#allocation4], 4294967040  ;;  %s965_s30 = sand.u32 1, %s758_s13   ;;  %p1061_p4 = scmp.ne.s32.totalorder %s1051_s22, 0 }
  0x58   : > { %s515_s19 = sshll.u32 %s965_s30, 5  ;;  %s222_s29 = scalar_lea.sflag [#allocation7], %s965_s30 }
  0x59   : > { %s225_s7 = scalar_lea.vmem [#allocation6], %s515_s19 }
  0x5a   : > { %745 = dma.done.wait (%p1061_p4), %s222_s29, 512  }
  0x5b   : > { %747 = vsyncadd (%p1061_p4), %s222_s29, 4294966784  ;;  %vm261_vm0 = vcmask 261120   ;;  %v780_v0 = vmov 0.0   ;;  %v264_v1 = vld [vmem:[%s225_s7] sm:$0xff]  ;;  %v265_v2 = vld [vmem:[%s225_s7 + $0x8] sm:$0xff]  ;;  %p253_p13 = scmp.lt.s32.totalorder %s766_s15, 2 }
  0x5c   : > { %263 = vst.msk [vmem:[#allocation2 + $0x8] sm:$0xff] %vm261_vm0, %v780_v0  ;;  %262 = vst.msk [vmem:[#allocation2] sm:$0xff] %vm261_vm0, %v780_v0  ;;  %v266_v3 = vld [vmem:[%s225_s7 + $0x10] sm:$0xff]  ;;  %v544_v4 = vpack.c.bf16 %v265_v2, %v264_v1  ;;  %v267_v5 = vld [vmem:[%s225_s7 + $0x18] sm:$0xff]  ;;  %s516_s22 = sshll.u32 %s965_s30, 4  ;;  %s526_s9 = sshll.u32 %s766_s15, 8 }
  0x5d   : > { %v270_v6 = vld [vmem:[#allocation3] sm:$0xff]  ;;  %v548_v7 = vpack.c.bf16 %v267_v5, %v266_v3  ;;  %v271_v8 = vld [vmem:[#allocation3 + $0x8] sm:$0xff]  ;;  %s254_s20 = scalar_select %p253_p13, %s766_s15, 2 }
  0x5e   : > { %541 = vmatprep.mubr.msk.f32.mxu0 %vm261_vm0, %v270_v6  ;;  %545 = vmatprep.subr.bf16.mxu0 %v544_v4  ;;  %s250_s18 = scalar_lea.vmem [#allocation8], %s516_s22  ;;  %s989_s21 = scalar_lea.hbm %s1044_s3, %s526_s9 }
  0x5f   : > { %547 = vmatpush3.bf16.msra.mxu0 %v544_v4  ;;  %s255_s11 = scalar_lea.vmem %s1043_s2, %s254_s20  ;;  %s390_s25 = sshll.u32 %s250_s18, 4  ;;  %s991_s25 = int_to_ptr.vmem [resolvable:$true] %s390_s25 }
  0x60   : > { %549 = vmatprep.subr.bf16.mxu0 %v548_v7  ;;  %v519_v15 = vld [vmem:[%s255_s11] ss:$0 sm:$0xff]  ;;  %s375_s15 = scalar_lea.sflag [#allocation5], %s965_s30  ;;  %s688_s4 = scalar_lea.vmem %s991_s25, 256 }
  0x61   : > { %p689_p6 = scmp.ne.s32.totalorder %s991_s25, %s688_s4  ;;  %s781_s6 = smov [#allocation8]  }
  0x62   : > { %s692_s19 = sshll.u32 %s781_s6, 4  ;;  %s693_s19 = int_to_ptr.vmem [resolvable:$false] %s692_s19 }
  0x63   : > { %551 = vmatpush3.bf16.msra.mxu0 %v548_v7  ;;  %v269_v9 = vld [vmem:[#allocation2 + $0x8] sm:$0xff]  ;;  %v268_v10 = vld [vmem:[#allocation2] sm:$0xff]  ;;  %p690_p8 = pnand %p689_p6, %p902_p11  ;;  %s694_s29 = scalar_lea.vmem %s693_s19, 512 }
  0x64   : > { %p695_p10 = scmp.lt.s32.totalorder %s991_s25, %s693_s19  ;;  %p696_p0 = scmp.lt.s32.totalorder %s694_s29, %s688_s4 }
  0x65   : > { %p691_p12 = pneg %p690_p8 }
  0x66   : > { %542 = vmatmul.mubr.msk.f32.vlgmr.msra.gmra.mrb[0].mxu0 %vm261_vm0, %v271_v8  ;;  %p697_p5 = por %p696_p0, %p695_p10 }
  0x68   : > { %p698_p9 = pnand %p697_p5, %p691_p12 }
 0x139   : > { %v543_v11 = vpop.f32.mrb[0].mxu0 }
 0x13a   : > { %v355_v12 = vadd.f32 %v543_v11, %v269_v9  ;;  %v345_v13 = vpop.f32.mrb[1].mxu0 }
 0x13b   : > { %v354_v14 = vadd.f32 %v345_v13, %v268_v10 }
 0x13c   : > { %357 = vst.msk [vmem:[#allocation2 + $0x8] sm:$0xff] %vm261_vm0, %v355_v12 }
 0x13d   : > { %356 = vst.msk [vmem:[#allocation2] sm:$0xff] %vm261_vm0, %v354_v14 }
 0x143   : > { %v363_v16 = vld [vmem:[#allocation2 + $0x8] sm:$0xff] }
 0x144   : > { %v362_v17 = vld [vmem:[#allocation2] sm:$0xff]  ;;  %v371_v18 = vadd.f32 %v519_v15, %v363_v16 }
 0x145   : > { %v370_v19 = vadd.f32 %v519_v15, %v362_v17 }
 0x146   : > { %373 = vst.msk [vmem:[%s250_s18 + $0x8] sm:$0xff] %vm261_vm0, %v371_v18 }
 0x147   : > { %372 = vst.msk [vmem:[%s250_s18] sm:$0xff] %vm261_vm0, %v370_v19 }
 0x148   : > { %701 = shalt.err (!%p698_p9)
}
 0x149   : > { %s702_s7 = scalar_lea.hbm %s989_s21, 256  ;;  %s706_s24 = scalar_lea.hbm %s1044_s3, 768 }
 0x14a   : > { %p703_p1 = scmp.ne.s32.totalorder %s989_s21, %s702_s7  ;;  %p707_p7 = scmp.lt.u32.totalorder %s989_s21, %s1044_s3 }
 0x14b   : > { %p708_p4 = scmp.lt.u32.totalorder %s706_s24, %s702_s7  ;;  %p710_p6 = scmp.lt.u32.totalorder %s702_s7, %s989_s21 }
 0x14c   : > { %p704_p2 = pnand %p703_p1, %p902_p11 }
 0x14d   : > { %p709_p13 = por %p708_p4, %p707_p7 }
 0x14e   : > { %p705_p3 = pneg %p704_p2 }
 0x14f   : > { %p711_p8 = por %p710_p6, %p709_p13 }
 0x151   : > { %p712_p12 = pnand %p711_p8, %p705_p3 }
 0x153   : > { %715 = shalt.err (!%p712_p12)
}
 0x154   : > { %s782_s9 = smov 128   ;;  %s783_s18 = smov 8  }
 0x155   : > { %558 = dma.vmem_to_hbm [thread:$0]  (%p902_p11), %s991_s25, 256, %s989_s21, %s375_s15, %s782_s9, %s782_s9, %s783_s18  }
 0x156 PF: > { %p575_p10 = scmp.ge.s32.totalorder %s774_s17, 2  ;;  %s405_s8 = sand.u32 1, %s754_s12  }
 0x157   : > { %p1062_p0 = scmp.ne.s32.totalorder %s1052_s23, 0  ;;  %s406_s26 = scalar_lea.sflag [#allocation5], %s405_s8 }
 0x159   : > { %p569_p5 = pnand %p575_p10, %p1062_p0 }
 0x15b   : > { %749 = dma.done.wait (!%p569_p5), %s406_s26, 256  }
 0x15c   : > { %751 = vsyncadd (!%p569_p5), %s406_s26, 4294967040  ;;  %s20_s17 = sadd.s32 1, %s774_s17   ;;  %s1063_s12 = smov %s758_s13 }
 0x15d   : > { %p17_p9 = scmp.ge.s32.totalorder %s20_s17, 5   ;;  %s1064_s13 = smov %s762_s14 }
 0x15e   : > { %s1065_s14 = smov %s911_s5  ;;  %s1066_s15 = smov %s770_s16 }
 0x15f   : > { %s1067_s16 = smov %s1069_s28  ;;  %19 = sbr.rel (!%p17_p9) target bundleno = 7 (0x7), region = 94 }
 0x166   :  { %411 = vsyncpa [#allocation4], 1 }
 0x167   :  { %413 = vsyncpa [#allocation4 + $0x1], 1 }
 0x168   :  { %414 = vsyncpa [#allocation7], 1 }
 0x169   :  { %416 = vsyncpa [#allocation7 + $0x1], 1 }
 0x16a   :  { %417 = vsyncpa [#allocation5], 1 }
 0x16b   :  { %419 = vsyncpa [#allocation5 + $0x1], 1 }

</bundles_post_ra>
